<compile_context>
chip_gen: v5e
topology: v5e:2x2
jax: 0.10.0
libtpu: 0.0.40
codegen_flags: <defaults>
</compile_context>

<pallas_src>
import math

import jax
import jax.numpy as jnp
from jax import lax
from jax.experimental import pallas as pl
from jax.experimental.pallas import tpu as pltpu

_INV_SQRT2 = 1.0 / math.sqrt(2.0)


def _gelu_exact(x):
    # Matches torch.nn.GELU() default (approximate='none').
    # TODO(synk): tanh-approx GELU would move this off the VPU erf polynomial
    # onto the idle EUP, but changes numerics vs. the torch module.
    return 0.5 * x * (1.0 + lax.erf(x * _INV_SQRT2))


def _mlp_kernel(x_ref, w1_ref, b1_ref, w2_ref, b2_ref, w3t_ref, b3_ref, o_ref):
    # Feature-major everywhere: batch is the lane (last) axis.
    x = x_ref[...]                         # (in_dim, TB)   -- t already folded in
    w1 = w1_ref[...]                       # (hid, in_dim)

    # ---- layer 1: K = in_dim (3) is tiny -> VPU broadcast-FMAs -------------
    h = w1[:, 0:1] * x[0:1, :] + b1_ref[...]          # (hid,1)*(1,TB)+(hid,1)
    for k in range(1, x.shape[0]):                     # static, in_dim-1 iters
        h = h + w1[:, k:k + 1] * x[k:k + 1, :]
    h = _gelu_exact(h)

    # ---- layer 2: (hid, hid) @ (hid, TB) on the MXU -------------------------
    h = jnp.dot(w2_ref[...], h,
                preferred_element_type=jnp.float32,
                precision=lax.Precision.HIGHEST) + b2_ref[...]
    h = _gelu_exact(h)

    # ---- layer 3: (out, hid) @ (hid, TB) on the MXU --------------------------
    # Single lane-dense full-block store (no masked per-row vst); MXU is idle
    # anyway, so HIGHEST precision here is free.
    o_ref[...] = (jnp.dot(w3t_ref[...], h,
                          preferred_element_type=jnp.float32,
                          precision=lax.Precision.HIGHEST)
                  + b3_ref[...]).astype(o_ref.dtype)


def mlp_pallas(xt, w1t, b1c, w2t, b2c, w3t, b3c, *, block_b=16384):
    """Fused 3-layer MLP, feature-major (features on sublanes, batch on lanes).

    xt:(in_dim,B) packed [x_flat; t], w1t:(hid,in_dim), b1c:(hid,1),
    w2t:(hid,hid), b2c:(hid,1), w3t:(out,hid), b3c:(out,1)  ->  (out, B)
    """
    in_dim, pb = xt.shape
    hid = w1t.shape[0]
    out_dim = w3t.shape[0]

    # Big lane-dense batch tile: amortizes ~0.35 us/step grid overhead.
    tb = pb if pb <= block_b else block_b
    grid = (pl.cdiv(pb, tb),)

    batch_spec = lambda rows: pl.BlockSpec((rows, tb), lambda i: (0, i))
    const_spec = lambda shape: pl.BlockSpec(shape, lambda i: (0, 0))

    flops = 2 * pb * (in_dim * hid + hid * hid + hid * out_dim)
    bytes_accessed = 4 * (pb * (in_dim + out_dim)
                          + in_dim * hid + hid * hid + hid * out_dim
                          + 2 * hid + out_dim)
    cost = pl.CostEstimate(flops=flops,
                           transcendentals=2 * pb * hid,
                           bytes_accessed=bytes_accessed)

    return pl.pallas_call(
        _mlp_kernel,
        out_shape=jax.ShapeDtypeStruct((out_dim, pb), jnp.float32),
        grid=grid,
        in_specs=[
            batch_spec(in_dim),            # packed [x; t]  (feature-major)
            const_spec((hid, in_dim)),     # W1^T           (VMEM-resident)
            const_spec((hid, 1)),          # b1
            const_spec((hid, hid)),        # W2^T
            const_spec((hid, 1)),          # b2
            const_spec((out_dim, hid)),    # W3^T
            const_spec((out_dim, 1)),      # b3
        ],
        out_specs=batch_spec(out_dim),
        compiler_params=pltpu.CompilerParams(
            # Batch axis is embarrassingly parallel.
            # TODO(synk): on v7x, CORE_PARALLEL on this axis guarantees the
            # two-TensorCore split; kept "parallel" for portability.
            dimension_semantics=("parallel",),
            # Explicit VMEM cap so the 16K-lane tile (+ double buffers and
            # (hid, TB) f32 intermediates) fits the v5e 16 MiB default scoped
            # limit and stays well under v7x's 64 MiB physical VMEM.
            vmem_limit_bytes=40 * 1024 * 1024),
        cost_estimate=cost,
    )(xt, w1t, b1c, w2t, b2c, w3t, b3c)


def model_forward(x, t, params, *, block_b=16384):
    """x: (bsz, num_vars, num_logits) f32, t: (bsz,) f32 -> same shape as x."""
    w1, b1, w2, b2, w3, b3 = params  # (in,hid),(1,hid),(hid,hid),(1,hid),(hid,out),(1,out)
    bsz, dim, _ = x.shape

    # Build the feature-major input and fold the t-concat into the same op:
    # one (in_dim, bsz) packed array, no x_cat round-trip in HBM, no separate
    # t input / DMA in the kernel.
    xt = jnp.concatenate([x.reshape(bsz, -1).T, t.reshape(1, bsz)], axis=0)

    # Pad the batch/lane axis up to a multiple of 128 so kernel stores are
    # lane-dense (only copies when padding is actually needed).
    pb = ((bsz + 127) // 128) * 128
    if pb != bsz:
        xt = jnp.pad(xt, ((0, 0), (0, pb - bsz)))

    out_fm = mlp_pallas(xt, w1.T, b1.T, w2.T, b2.T, w3.T, b3.T, block_b=block_b)

    # NOTE: if the consumer can accept feature-major (out_dim, bsz) activations,
    # return out_fm[:, :bsz] directly and skip this HBM transpose.
    return out_fm[:, :bsz].T.reshape(bsz, dim, -1)


def init_params(key, num_vars=2, num_classes=2, hidden_dim=32):
    num_logits = num_classes if num_classes > 2 else 1
    in_dim = num_vars * num_logits + 1
    out_dim = num_vars * num_logits
    k1, k2, k3, k4, k5, k6 = jax.random.split(key, 6)

    def lin(kw, kb, fan_in, fan_out):
        # Kaiming-uniform-ish deterministic init (shapes match nn.Linear)
        bound = 1.0 / math.sqrt(fan_in)
        w = jax.random.uniform(kw, (fan_in, fan_out), jnp.float32, -bound, bound)
        b = jax.random.uniform(kb, (1, fan_out), jnp.float32, -bound, bound)
        return w, b

    w1, b1 = lin(k1, k2, in_dim, hidden_dim)
    w2, b2 = lin(k3, k4, hidden_dim, hidden_dim)
    w3, b3 = lin(k5, k6, hidden_dim, out_dim)
    return (w1, b1, w2, b2, w3, b3)


if __name__ == "__main__":
    num_vars, num_classes, hidden_dim = 2, 2, 32
    num_logits = num_classes if num_classes > 2 else 1
    bsz = 8

    key = jax.random.PRNGKey(0)
    kx, kt, kp = jax.random.split(key, 3)
    x = jax.random.normal(kx, (bsz, num_vars, num_logits), jnp.float32)
    t = jax.random.uniform(kt, (bsz,), jnp.float32)
    params = init_params(kp, num_vars, num_classes, hidden_dim)

    out = jax.jit(model_forward)(x, t, params)
    jax.block_until_ready(out)

    # Reference check in plain JAX (f32 / HIGHEST precision, exact-erf GELU).
    w1, b1, w2, b2, w3, b3 = params
    hp = lax.Precision.HIGHEST
    xc = jnp.concatenate([x.reshape(bsz, -1), t[:, None]], axis=-1)
    h = _gelu_exact(jnp.dot(xc, w1, precision=hp) + b1)
    h = _gelu_exact(jnp.dot(h, w2, precision=hp) + b2)
    ref = (jnp.dot(h, w3, precision=hp) + b3).reshape(bsz, num_vars, -1)
    assert out.shape == (bsz, num_vars, num_logits)
    assert jnp.allclose(out, ref, atol=1e-5, rtol=1e-5)

    print("KERNEL_OK")
</pallas_src>

<mosaic_0001>
module attributes {stable_mosaic.version = 11 : i64} {
  func.func @_mlp_kernel(%arg0: i32, %arg1: memref<3x128xf32, #tpu.memory_space<vmem>>, %arg2: memref<32x3xf32, #tpu.memory_space<vmem>>, %arg3: memref<32x1xf32, #tpu.memory_space<vmem>>, %arg4: memref<32x32xf32, #tpu.memory_space<vmem>>, %arg5: memref<32x1xf32, #tpu.memory_space<vmem>>, %arg6: memref<2x32xf32, #tpu.memory_space<vmem>>, %arg7: memref<2x1xf32, #tpu.memory_space<vmem>>, %arg8: memref<2x128xf32, #tpu.memory_space<vmem>>) attributes {dimension_semantics = [#tpu.dimension_semantics<parallel>], iteration_bounds = array<i64: 1>, scalar_prefetch = 0 : i64, scratch_operands = 0 : i64, tpu.core_type = #tpu.core_type<tc>, window_params = [{transform_indices = @transform_0, window_bounds = array<i64: 3, 128>}, {pipeline_mode = #tpu.pipeline_mode<synchronous>, transform_indices = @transform_1, window_bounds = array<i64: 32, 3>}, {pipeline_mode = #tpu.pipeline_mode<synchronous>, transform_indices = @transform_2, window_bounds = array<i64: 32, 1>}, {pipeline_mode = #tpu.pipeline_mode<synchronous>, transform_indices = @transform_3, window_bounds = array<i64: 32, 32>}, {pipeline_mode = #tpu.pipeline_mode<synchronous>, transform_indices = @transform_4, window_bounds = array<i64: 32, 1>}, {pipeline_mode = #tpu.pipeline_mode<synchronous>, transform_indices = @transform_5, window_bounds = array<i64: 2, 32>}, {pipeline_mode = #tpu.pipeline_mode<synchronous>, transform_indices = @transform_6, window_bounds = array<i64: 2, 1>}, {transform_indices = @transform_7, window_bounds = array<i64: 2, 128>}]} {
    %c0 = arith.constant 0 : index
    %c0_0 = arith.constant 0 : index
    %0 = vector.load %arg1[%c0, %c0_0] : memref<3x128xf32, #tpu.memory_space<vmem>>, vector<3x128xf32>
    %c0_1 = arith.constant 0 : index
    %c0_2 = arith.constant 0 : index
    %1 = vector.load %arg2[%c0_1, %c0_2] : memref<32x3xf32, #tpu.memory_space<vmem>>, vector<32x3xf32>
    %2 = vector.extract_strided_slice %1 {offsets = [0, 0], sizes = [32, 1], strides = [1, 1]} : vector<32x3xf32> to vector<32x1xf32>
    %3 = vector.extract_strided_slice %0 {offsets = [0, 0], sizes = [1, 128], strides = [1, 1]} : vector<3x128xf32> to vector<1x128xf32>
    %4 = vector.broadcast %2 : vector<32x1xf32> to vector<32x128xf32>
    %5 = vector.broadcast %3 : vector<1x128xf32> to vector<32x128xf32>
    %6 = arith.mulf %4, %5 : vector<32x128xf32>
    %c0_3 = arith.constant 0 : index
    %c0_4 = arith.constant 0 : index
    %7 = vector.load %arg3[%c0_3, %c0_4] : memref<32x1xf32, #tpu.memory_space<vmem>>, vector<32x1xf32>
    %8 = vector.broadcast %7 : vector<32x1xf32> to vector<32x128xf32>
    %9 = arith.addf %6, %8 : vector<32x128xf32>
    %10 = vector.extract_strided_slice %1 {offsets = [0, 1], sizes = [32, 1], strides = [1, 1]} : vector<32x3xf32> to vector<32x1xf32>
    %11 = vector.extract_strided_slice %0 {offsets = [1, 0], sizes = [1, 128], strides = [1, 1]} : vector<3x128xf32> to vector<1x128xf32>
    %12 = vector.broadcast %10 : vector<32x1xf32> to vector<32x128xf32>
    %13 = vector.broadcast %11 : vector<1x128xf32> to vector<32x128xf32>
    %14 = arith.mulf %12, %13 : vector<32x128xf32>
    %15 = arith.addf %9, %14 : vector<32x128xf32>
    %16 = vector.extract_strided_slice %1 {offsets = [0, 2], sizes = [32, 1], strides = [1, 1]} : vector<32x3xf32> to vector<32x1xf32>
    %17 = vector.extract_strided_slice %0 {offsets = [2, 0], sizes = [1, 128], strides = [1, 1]} : vector<3x128xf32> to vector<1x128xf32>
    %18 = vector.broadcast %16 : vector<32x1xf32> to vector<32x128xf32>
    %19 = vector.broadcast %17 : vector<1x128xf32> to vector<32x128xf32>
    %20 = arith.mulf %18, %19 : vector<32x128xf32>
    %21 = arith.addf %15, %20 : vector<32x128xf32>
    %cst = arith.constant 5.000000e-01 : f32
    %22 = vector.broadcast %cst : f32 to vector<32x128xf32>
    %23 = arith.mulf %22, %21 : vector<32x128xf32>
    %cst_5 = arith.constant 0.707106769 : f32
    %24 = vector.broadcast %cst_5 : f32 to vector<32x128xf32>
    %25 = arith.mulf %21, %24 : vector<32x128xf32>
    %26 = math.erf %25 : vector<32x128xf32>
    %cst_6 = arith.constant 1.000000e+00 : f32
    %27 = vector.broadcast %cst_6 : f32 to vector<32x128xf32>
    %28 = arith.addf %27, %26 : vector<32x128xf32>
    %29 = arith.mulf %23, %28 : vector<32x128xf32>
    %c0_7 = arith.constant 0 : index
    %c0_8 = arith.constant 0 : index
    %30 = vector.load %arg4[%c0_7, %c0_8] : memref<32x32xf32, #tpu.memory_space<vmem>>, vector<32x32xf32>
    %cst_9 = arith.constant dense<0.000000e+00> : vector<32x128xf32>
    %31 = tpu.matmul %30, %29, %cst_9 {dimension_numbers = #tpu.dot_dimension_numbers<[1], [0], [0], [1], [0, 0, 1, 1], [], []>, precision = #tpu.contract_precision<fp32>} : vector<32x32xf32>, vector<32x128xf32>, vector<32x128xf32> -> vector<32x128xf32>
    %c0_10 = arith.constant 0 : index
    %c0_11 = arith.constant 0 : index
    %32 = vector.load %arg5[%c0_10, %c0_11] : memref<32x1xf32, #tpu.memory_space<vmem>>, vector<32x1xf32>
    %33 = vector.broadcast %32 : vector<32x1xf32> to vector<32x128xf32>
    %34 = arith.addf %31, %33 : vector<32x128xf32>
    %cst_12 = arith.constant 5.000000e-01 : f32
    %35 = vector.broadcast %cst_12 : f32 to vector<32x128xf32>
    %36 = arith.mulf %35, %34 : vector<32x128xf32>
    %cst_13 = arith.constant 0.707106769 : f32
    %37 = vector.broadcast %cst_13 : f32 to vector<32x128xf32>
    %38 = arith.mulf %34, %37 : vector<32x128xf32>
    %39 = math.erf %38 : vector<32x128xf32>
    %cst_14 = arith.constant 1.000000e+00 : f32
    %40 = vector.broadcast %cst_14 : f32 to vector<32x128xf32>
    %41 = arith.addf %40, %39 : vector<32x128xf32>
    %42 = arith.mulf %36, %41 : vector<32x128xf32>
    %c0_15 = arith.constant 0 : index
    %c0_16 = arith.constant 0 : index
    %43 = vector.load %arg6[%c0_15, %c0_16] : memref<2x32xf32, #tpu.memory_space<vmem>>, vector<2x32xf32>
    %cst_17 = arith.constant dense<0.000000e+00> : vector<2x128xf32>
    %44 = tpu.matmul %43, %42, %cst_17 {dimension_numbers = #tpu.dot_dimension_numbers<[1], [0], [0], [1], [0, 0, 1, 1], [], []>, precision = #tpu.contract_precision<fp32>} : vector<2x32xf32>, vector<32x128xf32>, vector<2x128xf32> -> vector<2x128xf32>
    %c0_18 = arith.constant 0 : index
    %c0_19 = arith.constant 0 : index
    %45 = vector.load %arg7[%c0_18, %c0_19] : memref<2x1xf32, #tpu.memory_space<vmem>>, vector<2x1xf32>
    %46 = vector.broadcast %45 : vector<2x1xf32> to vector<2x128xf32>
    %47 = arith.addf %44, %46 : vector<2x128xf32>
    %c0_20 = arith.constant 0 : index
    %c0_21 = arith.constant 0 : index
    %48 = vector.load %arg8[%c0_20, %c0_21] : memref<2x128xf32, #tpu.memory_space<vmem>>, vector<2x128xf32>
    tpu.vector_store %arg8[%c0_20, %c0_21], %47 {strides = array<i32>} : memref<2x128xf32, #tpu.memory_space<vmem>>, vector<2x128xf32>,
    return
  }
  func.func @transform_0(%arg0: i32) -> (i32, i32) {
    %c0_i32 = arith.constant 0 : i32
    %c0_i32_0 = arith.constant 0 : i32
    return %c0_i32, %arg0 : i32, i32
  }
  func.func @transform_1(%arg0: i32) -> (i32, i32) {
    %c0_i32 = arith.constant 0 : i32
    %c0_i32_0 = arith.constant 0 : i32
    %c0_i32_1 = arith.constant 0 : i32
    return %c0_i32, %c0_i32_0 : i32, i32
  }
  func.func @transform_2(%arg0: i32) -> (i32, i32) {
    %c0_i32 = arith.constant 0 : i32
    %c0_i32_0 = arith.constant 0 : i32
    %c0_i32_1 = arith.constant 0 : i32
    return %c0_i32, %c0_i32_0 : i32, i32
  }
  func.func @transform_3(%arg0: i32) -> (i32, i32) {
    %c0_i32 = arith.constant 0 : i32
    %c0_i32_0 = arith.constant 0 : i32
    %c0_i32_1 = arith.constant 0 : i32
    return %c0_i32, %c0_i32_0 : i32, i32
  }
  func.func @transform_4(%arg0: i32) -> (i32, i32) {
    %c0_i32 = arith.constant 0 : i32
    %c0_i32_0 = arith.constant 0 : i32
    %c0_i32_1 = arith.constant 0 : i32
    return %c0_i32, %c0_i32_0 : i32, i32
  }
  func.func @transform_5(%arg0: i32) -> (i32, i32) {
    %c0_i32 = arith.constant 0 : i32
    %c0_i32_0 = arith.constant 0 : i32
    %c0_i32_1 = arith.constant 0 : i32
    return %c0_i32, %c0_i32_0 : i32, i32
  }
  func.func @transform_6(%arg0: i32) -> (i32, i32) {
    %c0_i32 = arith.constant 0 : i32
    %c0_i32_0 = arith.constant 0 : i32
    %c0_i32_1 = arith.constant 0 : i32
    return %c0_i32, %c0_i32_0 : i32, i32
  }
  func.func @transform_7(%arg0: i32) -> (i32, i32) {
    %c0_i32 = arith.constant 0 : i32
    %c0_i32_0 = arith.constant 0 : i32
    return %c0_i32, %arg0 : i32, i32
  }
}

</mosaic_0001>

<bundles_post_ra>
// kernel: model_forward.1
= control target key start
LH: loop header
LB: loop body
LE: loop exit
PB: predicated region body
PF: predicated region fallthrough
CT: control target
= control target key end

     0   :  { %v1086_v2 = vmov 0   ;;  %s1464_s0 = inlined_call_operand.vmem [shape: f32[3,128], index: 0, kind: input, shape index: {}]   ;;  %s1465_s1 = inlined_call_operand.vmem [shape: f32[32,3], index: 1, kind: input, shape index: {}]   ;;  %s1466_s2 = inlined_call_operand.vmem [shape: f32[32,1], index: 2, kind: input, shape index: {}]   ;;  %s1467_s3 = inlined_call_operand.vmem [shape: f32[32,32], index: 3, kind: input, shape index: {}]   ;;  %s1468_s4 = inlined_call_operand.vmem [shape: f32[32,1], index: 4, kind: input, shape index: {}]   ;;  %s1469_s5 = inlined_call_operand.vmem [shape: f32[2,32], index: 5, kind: input, shape index: {}]   ;;  %s1470_s6 = inlined_call_operand.vmem [shape: f32[2,1], index: 6, kind: input, shape index: {}]   ;;  %s1471_s7 = inlined_call_operand.hbm [shape: f32[2,128], index: 7, kind: output, shape index: {}]  }
   0x1   :  { %v60_v0 = vld [vmem:[%s1466_s2 + $0x18] sm:$0xff]  ;;  %1031 = vset.pattern.permute.xlu1 %v1086_v2  ;;  %1030 = vset.pattern.permute.xlu0 %v1086_v2  ;;  %v29_v3 = vld [vmem:[%s1465_s1 + $0x8] sm:$0xff] }
   0x2   :  { %v31_v1 = vld [vmem:[%s1465_s1 + $0x18] sm:$0xff]  ;;  %78 = vperm.xlu1 %1031, %v60_v0  }
   0x3   :  { %49 = vperm.xlu0 %1030, %v31_v1  }
   0x4   :  { %12 = vsyncpa [#allocation3], 0  ;;  %1033 = vset.pattern.permute.xlu2 %v1086_v2  ;;  %v30_v4 = vld [vmem:[%s1465_s1 + $0x10] sm:$0xff]  ;;  %v1087_v6 = vmov 1   ;;  %v28_v7 = vld [vmem:[%s1465_s1] sm:$0xff]  ;;  %v1088_v8 = vmov 2  }
   0x5   :  { %39 = vperm.xlu2 %1033, %v29_v3   ;;  %v59_v5 = vld [vmem:[%s1466_s2 + $0x10] sm:$0xff]  ;;  %v58_v9 = vld [vmem:[%s1466_s2 + $0x8] sm:$0xff]  ;;  %v57_v10 = vld [vmem:[%s1466_s2] sm:$0xff]  ;;  %vm339_vm8 = vcmask 261120   ;;  %s1009_s13 = sshll.u32 %s1471_s7, 4  ;;  %s1010_s13 = int_to_ptr.hbm [resolvable:$true] %s1009_s13 }
   0x6   :  { %v27_v16 = vld [vmem:[%s1464_s0] sm:$0x7] }
   0x7   :  { %v52_v18 = vperm.slane %v27_v16, 0  ;;  %v101_v20 = vperm.slane %v27_v16, 1  ;;  %v126_v24 = vperm.slane %v27_v16, 2 }
   0xa   :  { %1032 = vset.pattern.permute.xlu1 %v1087_v6 }
   0xb   :  { %44 = vperm.xlu0 %1030, %v30_v4   ;;  %98 = vperm.xlu1 %1032, %v31_v1  }
   0xd   :  { %73 = vperm.xlu2 %1033, %v59_v5  }
  0x13   :  { %1034 = vset.pattern.permute.xlu0 %v1087_v6  ;;  %1035 = vset.pattern.permute.xlu1 %v1088_v8 }
  0x14   :  { %94 = vperm.xlu0 %1034, %v30_v4   ;;  %123 = vperm.xlu1 %1035, %v31_v1  }
  0x15   :  { %34 = vperm.xlu2 %1033, %v28_v7  }
  0x1c   :  { %1038 = vset.pattern.permute.xlu0 %v1088_v8  ;;  %1036 = vset.pattern.permute.xlu1 %v1086_v2 }
  0x1d   :  { %119 = vperm.xlu0 %1038, %v30_v4   ;;  %68 = vperm.xlu1 %1036, %v58_v9  }
  0x1e   :  { %1037 = vset.pattern.permute.xlu2 %v1087_v6 }
  0x1f   :  { %90 = vperm.xlu2 %1037, %v29_v3  }
  0x25   :  { %1041 = vset.pattern.permute.xlu0 %v1086_v2  ;;  %63 = vperm.xlu1 %1036, %v57_v10  }
  0x27   :  { %86 = vperm.xlu2 %1037, %v28_v7  }
  0x2d   :  { %1039 = vset.pattern.permute.xlu1 %v1088_v8 }
  0x2e   :  { %115 = vperm.xlu1 %1039, %v29_v3  }
  0x2f   :  { %1040 = vset.pattern.permute.xlu2 %v1088_v8 }
  0x30   :  { %111 = vperm.xlu2 %1040, %v28_v7  }
  0x36   :  { %1042 = vset.pattern.permute.xlu1 %v1086_v2 }
  0x38   :  { %1043 = vset.pattern.permute.xlu2 %v1086_v2 }
  0x5f   :  { %v40_v11 = vpop.permute.xlu2 %39 }
  0x60   :  { %v54_v1 = vmul.f32 %v52_v18, %v40_v11 }
  0x67   :  { %v74_v12 = vpop.permute.xlu2 %73 }
  0x6f   :  { %v35_v15 = vpop.permute.xlu2 %34 }
  0x70   :  { %v53_v51 = vmul.f32 %v52_v18, %v35_v15 }
  0x74   :  { %v79_v13 = vpop.permute.xlu1 %78 }
  0x75   :  { %v50_v14 = vpop.permute.xlu0 %49 }
  0x76   :  { %v56_v21 = vmul.f32 %v52_v18, %v50_v14 }
  0x78   :  { %v84_v25 = vadd.f32 %v79_v13, %v56_v21 }
  0x79   :  { %v91_v22 = vpop.permute.xlu2 %90 }
  0x7a   :  { %v103_v7 = vmul.f32 %v101_v20, %v91_v22 }
  0x7d   :  { %v45_v17 = vpop.permute.xlu0 %44  ;;  %v99_v19 = vpop.permute.xlu1 %98 }
  0x7e   :  { %v105_v23 = vmul.f32 %v101_v20, %v99_v19  ;;  %v55_v30 = vmul.f32 %v52_v18, %v45_v17 }
  0x80   :  { %v109_v28 = vadd.f32 %v105_v23, %v84_v25  ;;  %v83_v35 = vadd.f32 %v74_v12, %v55_v30 }
  0x81   :  { %v87_v34 = vpop.permute.xlu2 %86 }
  0x82   :  { %v102_v57 = vmul.f32 %v101_v20, %v87_v34 }
  0x86   :  { %v95_v26 = vpop.permute.xlu0 %94  ;;  %v124_v27 = vpop.permute.xlu1 %123 }
  0x87   :  { %v130_v29 = vmul.f32 %v126_v24, %v124_v27  ;;  %v104_v32 = vmul.f32 %v101_v20, %v95_v26 }
  0x89   :  { %v1157_v31 = vadd.f32 %v130_v29, %v109_v28  ;;  %v108_v38 = vadd.f32 %v104_v32, %v83_v35 }
  0x8a   :  { %v112_v50 = vpop.permute.xlu2 %111 }
  0x8b   :  { %v1160_v33 = vmul.f32 0.70710677, %v1157_v31  ;;  %v127_v59 = vmul.f32 %v126_v24, %v112_v50 }
  0x8d   :  { %v263_v36 = vmul.f32 %v1160_v33, %v1160_v33 }
  0x8f   :  { %v120_v37 = vpop.permute.xlu0 %119  ;;  %v1164_v39 = vmin.f32 %v263_v36, 16.0  ;;  %v69_v41 = vpop.permute.xlu1 %68 }
  0x90   :  { %v129_v40 = vmul.f32 %v126_v24, %v120_v37  ;;  %v82_v8 = vadd.f32 %v69_v41, %v54_v1 }
  0x91   :  { %v265_v42 = vmul.f32 2.1237322e-06, %v1164_v39  ;;  %v276_v43 = vmul.f32 3.8918573e-05, %v1164_v39 }
  0x92   :  { %v1168_v44 = vadd.f32 %v129_v40, %v108_v38  ;;  %v107_v19 = vadd.f32 %v103_v7, %v82_v8 }
  0x93   :  { %v266_v45 = vadd.f32 0.00028619796, %v265_v42  ;;  %v277_v46 = vadd.f32 0.001143296, %v276_v43 }
  0x94   :  { %v1171_v47 = vmul.f32 0.70710677, %v1168_v44 }
  0x95   :  { %v267_v48 = vmul.f32 %v266_v45, %v1164_v39  ;;  %v278_v49 = vmul.f32 %v277_v46, %v1164_v39 }
  0x96   :  { %v223_v52 = vmul.f32 %v1171_v47, %v1171_v47 }
  0x97   :  { %v268_v53 = vadd.f32 0.0036580483, %v267_v48  ;;  %v279_v54 = vadd.f32 0.014752088, %v278_v49  ;;  %v64_v55 = vpop.permute.xlu1 %63 }
  0x98   :  { %v1177_v56 = vmin.f32 %v223_v52, 16.0  ;;  %v81_v58 = vadd.f32 %v64_v55, %v53_v51 }
  0x99   :  { %v280_v60 = vmul.f32 %v279_v54, %v1164_v39  ;;  %v269_v61 = vmul.f32 %v268_v53, %v1164_v39 }
  0x9a   :  { %v225_v62 = vmul.f32 2.1237322e-06, %v1177_v56  ;;  %v236_v63 = vmul.f32 3.8918573e-05, %v1177_v56  ;;  %v106_v0 = vadd.f32 %v102_v57, %v81_v58 }
  0x9b   :  { %v281_v2 = vadd.f32 0.112945676, %v280_v60  ;;  %v270_v9 = vadd.f32 0.05243302, %v269_v61 }
  0x9c   :  { %v226_v3 = vadd.f32 0.00028619796, %v225_v62  ;;  %v237_v4 = vadd.f32 0.001143296, %v236_v63  ;;  %v1183_v5 = vadd.f32 %v127_v59, %v106_v0 }
  0x9d   :  { %v282_v6 = vmul.f32 %v281_v2, %v1164_v39  ;;  %v271_v21 = vmul.f32 %v270_v9, %v1164_v39 }
  0x9e   :  { %v227_v10 = vmul.f32 %v226_v3, %v1177_v56  ;;  %v238_v12 = vmul.f32 %v237_v4, %v1177_v56  ;;  %v1189_v13 = vmul.f32 0.70710677, %v1183_v5 }
  0x9f   :  { %v283_v14 = vadd.f32 0.4994258, %v282_v6  ;;  %v272_v30 = vadd.f32 0.18741608, %v271_v21 }
  0xa0   :  { %v228_v15 = vadd.f32 0.0036580483, %v227_v10  ;;  %v239_v11 = vadd.f32 0.014752088, %v238_v12  ;;  %v143_v16 = vmul.f32 %v1189_v13, %v1189_v13  ;;  %v116_v17 = vpop.permute.xlu1 %115 }
  0xa1   :  { %v284_v18 = vmul.f32 %v283_v14, %v1164_v39  ;;  %v128_v20 = vmul.f32 %v126_v24, %v116_v17  ;;  %v273_v42 = vmul.f32 %v272_v30, %v1164_v39 }
  0xa2   :  { %v240_v22 = vmul.f32 %v239_v11, %v1177_v56  ;;  %v1196_v23 = vmin.f32 %v143_v16, 16.0  ;;  %v229_v26 = vmul.f32 %v228_v15, %v1177_v56 }
  0xa3   :  { %v285_v25 = vadd.f32 1.0, %v284_v18  ;;  %v1199_v27 = vadd.f32 %v128_v20, %v107_v19  ;;  %v274_v57 = vadd.f32 1.1283791, %v273_v42 }
  0xa4   :  { %v241_v28 = vadd.f32 0.112945676, %v240_v22  ;;  %v145_v29 = vmul.f32 2.1237322e-06, %v1196_v23  ;;  %v230_v24 = vadd.f32 0.05243302, %v229_v26 }
  0xa5   :  { %1044 = vrcp.f32 %v285_v25  ;;  %v156_v35 = vmul.f32 3.8918573e-05, %v1196_v23  ;;  %v1205_v36 = vmul.f32 0.70710677, %v1199_v27  ;;  %v295_v39 = vand.u32 2147483647, %v285_v25 }
  0xa6   :  { %v242_v32 = vmul.f32 %v241_v28, %v1177_v56  ;;  %v146_v34 = vadd.f32 0.00028619796, %v145_v29  ;;  %v231_v46 = vmul.f32 %v230_v24, %v1177_v56  ;;  %v297_v59 = vand.u32 2147483648, %v285_v25 }
  0xa7   :  { %v157_v40 = vadd.f32 0.001143296, %v156_v35  ;;  %v183_v41 = vmul.f32 %v1205_v36, %v1205_v36  ;;  %vm291_vm1 = vweird.f32 %v285_v25  ;;  %v275_v12 = vmul.f32 %v274_v57, %v1160_v33 }
  0xa8   :  { %v243_v37 = vadd.f32 0.4994258, %v242_v32  ;;  %v147_v38 = vmul.f32 %v146_v34, %v1196_v23  ;;  %v232_v60 = vadd.f32 0.18741608, %v231_v46  ;;  %v298_v7 = vor.u32 1.1754944e-38, %v297_v59 }
  0xa9   :  { %v158_v48 = vmul.f32 %v157_v40, %v1196_v23  ;;  %v1214_v49 = vmin.f32 %v183_v41, 16.0  ;;  %vm296_vm3 = vcmp.eq.f32.partialorder %v295_v39, 8.507059e+37  ;;  %v138_v22 = vmul.f32 0.5, %v1157_v31 }
  0xaa   :  { %v244_v43 = vmul.f32 %v243_v37, %v1177_v56  ;;  %v148_v52 = vadd.f32 0.0036580483, %v147_v38  ;;  %v233_v8 = vmul.f32 %v232_v60, %v1177_v56  ;;  %v137_v60 = vmul.f32 0.5, %v1168_v44 }
  0xab   :  { %v1045_v45 = vpop.eup %1044  ;;  %v159_v53 = vadd.f32 0.014752088, %v158_v48  ;;  %v185_v54 = vmul.f32 2.1237322e-06, %v1214_v49  ;;  %v196_v55 = vmul.f32 3.8918573e-05, %v1214_v49 }
  0xac   :  { %v287_v50 = vmul.f32 %v1045_v45, %v285_v25  ;;  %v245_v51 = vadd.f32 1.0, %v244_v43  ;;  %vm292_vm0 = vweird.f32 %v1045_v45  ;;  %v149_v1 = vmul.f32 %v148_v52, %v1196_v23 }
  0xad   :  { %v160_v61 = vmul.f32 %v159_v53, %v1196_v23  ;;  %v186_v63 = vadd.f32 0.00028619796, %v185_v54  ;;  %v197_v0 = vadd.f32 0.001143296, %v196_v55  ;;  %vm293_vm2 = vmor %vm291_vm1, %vm292_vm0  ;;  %v234_v25 = vadd.f32 1.1283791, %v233_v8 }
  0xae   :  { %v288_v58 = vsub.f32 1.0, %v287_v50  ;;  %1046 = vrcp.f32 %v245_v51  ;;  %v150_v17 = vadd.f32 0.05243302, %v149_v1  ;;  %v257_v28 = vand.u32 2147483648, %v245_v51  ;;  %v311_v8 = vld [vmem:[%s1467_s3] sm:$0xff] }
  0xaf   :  { %v161_v2 = vadd.f32 0.112945676, %v160_v61  ;;  %v187_v4 = vmul.f32 %v186_v63, %v1214_v49  ;;  %v198_v6 = vmul.f32 %v197_v0, %v1214_v49  ;;  %v255_v32 = vand.u32 2147483647, %v245_v51 }
  0xb0   :  { %v289_v62 = vmul.f32 %v1045_v45, %v288_v58  ;;  %v151_v34 = vmul.f32 %v150_v17, %v1196_v23  ;;  %vm251_vm5 = vweird.f32 %v245_v51  ;;  %v235_v41 = vmul.f32 %v234_v25, %v1171_v47 }
  0xb1   :  { %v162_v9 = vmul.f32 %v161_v2, %v1196_v23  ;;  %v199_v15 = vadd.f32 0.014752088, %v198_v6  ;;  %v188_v20 = vadd.f32 0.0036580483, %v187_v4  ;;  %v258_v42 = vor.u32 1.1754944e-38, %v257_v28 }
  0xb2   :  { %v290_v3 = vadd.f32 %v1045_v45, %v289_v62  ;;  %vm256_vm7 = vcmp.eq.f32.partialorder %v255_v32, 8.507059e+37  ;;  %v312_v32 = vld [vmem:[%s1467_s3 + $0x8] sm:$0xff] }
  0xb3   :  { %v163_v19 = vadd.f32 0.4994258, %v162_v9  ;;  %v200_v21 = vmul.f32 %v199_v15, %v1214_v49  ;;  %v189_v37 = vmul.f32 %v188_v20, %v1214_v49 }
  0xb4   :  { %v1047_v10 = vpop.eup %1046  ;;  %v294_v14 = vsel %vm293_vm2, %v1045_v45, %v290_v3  ;;  %v152_v45 = vadd.f32 0.18741608, %v151_v34  ;;  %v135_v34 = vmul.f32 0.5, %v1183_v5 }
  0xb5   :  { %v299_v11 = vsel %vm296_vm3, %v298_v7, %v294_v14  ;;  %v247_v16 = vmul.f32 %v1047_v10, %v245_v51  ;;  %v164_v29 = vmul.f32 %v163_v19, %v1196_v23  ;;  %v201_v33 = vadd.f32 0.112945676, %v200_v21 }
  0xb6   :  { %v300_v18 = vmul.f32 %v299_v11, %v275_v12  ;;  %vm252_vm4 = vweird.f32 %v1047_v10  ;;  %v190_v50 = vadd.f32 0.05243302, %v189_v37  ;;  %v153_v55 = vmul.f32 %v152_v45, %v1196_v23 }
  0xb7   :  { %v248_v56 = vsub.f32 1.0, %v247_v16  ;;  %v165_v35 = vadd.f32 1.0, %v164_v29  ;;  %v202_v38 = vmul.f32 %v201_v33, %v1214_v49  ;;  %vm253_vm6 = vmor %vm251_vm5, %vm252_vm4  ;;  %v341_v16 = vsel %vm339_vm8, %v311_v8, 0 }
  0xb8   :  { %v1021_v26 = vclamps-f32 %v300_v18, 1.0  ;;  %v191_v39 = vmul.f32 %v190_v50, %v1214_v49  ;;  %v154_v0 = vadd.f32 1.1283791, %v153_v55  ;;  %v1275_v28 = vand.u32 4294901760, %v341_v16 }
  0xb9   :  { %v249_v30 = vmul.f32 %v1047_v10, %v248_v56  ;;  %1048 = vrcp.f32 %v165_v35  ;;  %v203_v46 = vadd.f32 0.4994258, %v202_v38  ;;  %v175_v2 = vand.u32 2147483647, %v165_v35 }
  0xba   :  { %v306_v24 = vadd.f32 1.0, %v1021_v26  ;;  %v177_v3 = vand.u32 2147483648, %v165_v35  ;;  %v192_v4 = vadd.f32 0.18741608, %v191_v39  ;;  %vm171_vm10 = vweird.f32 %v165_v35 }
  0xbb   :  { %v250_v40 = vadd.f32 %v1047_v10, %v249_v30  ;;  %v204_v54 = vmul.f32 %v203_v46, %v1214_v49  ;;  %v155_v14 = vmul.f32 %v154_v0, %v1189_v13  ;;  %vm176_vm12 = vcmp.eq.f32.partialorder %v175_v2, 8.507059e+37  ;;  %v317_v13 = vld [vmem:[%s1468_s4 + $0x10] sm:$0xff] }
  0xbc   :  { %v310_v31 = vmul.f32 %v306_v24, %v138_v22  ;;  %v178_v15 = vor.u32 1.1754944e-38, %v177_v3  ;;  %v193_v11 = vmul.f32 %v192_v4, %v1214_v49  ;;  %331 = vperm.xlu1 %1042, %v317_v13   ;;  %v373_v38 = vsub.f32 %v341_v16, %v1275_v28  ;;  %v318_v16 = vld [vmem:[%s1468_s4 + $0x18] sm:$0xff] }
  0xbd   :  { %v254_v43 = vsel %vm253_vm6, %v1047_v10, %v250_v40  ;;  %v1241_v57 = vadd.f32 1.0, %v204_v54  ;;  %v344_v40 = vsel %vm339_vm8, %v312_v32, 0  ;;  %v313_v54 = vld [vmem:[%s1467_s3 + $0x10] sm:$0xff]  ;;  %336 = vperm.xlu0 %1041, %v318_v16  }
  0xbe   :  { %v259_v48 = vsel %vm256_vm7, %v258_v42, %v254_v43  ;;  %v1232_v52 = vand.u32 4294901760, %v310_v31  ;;  %v194_v25 = vadd.f32 1.1283791, %v193_v11  ;;  %v374_v46 = vand.u32 4294901760, %v373_v38 }
  0xbf   :  { %v260_v53 = vmul.f32 %v259_v48, %v235_v41  ;;  %v1049_v58 = vpop.eup %1048  ;;  %1050 = vrcp.f32 %v1241_v57  ;;  %v215_v56 = vand.u32 2147483647, %v1241_v57  ;;  %v217_v26 = vand.u32 2147483648, %v1241_v57 }
  0xc0   :  { %365 = vmatpush.msra.mxu0 %v1232_v52  ;;  %516 = vmatpush.msra.mxu3 %v1232_v52  ;;  %v1238_v47 = vsub.f32 %v310_v31, %v1232_v52  ;;  %v167_v62 = vmul.f32 %v1049_v58, %v165_v35  ;;  %vm172_vm9 = vweird.f32 %v1049_v58  ;;  %vm211_vm14 = vweird.f32 %v1241_v57  ;;  %v315_v31 = vld [vmem:[%s1468_s4] sm:$0xff] }
  0xc1   :  { %v1020_v51 = vclamps-f32 %v260_v53, 1.0  ;;  %vm173_vm11 = vmor %vm171_vm10, %vm172_vm9  ;;  %v218_v37 = vor.u32 1.1754944e-38, %v217_v26  ;;  %v195_v42 = vmul.f32 %v194_v25, %v1205_v36  ;;  %vm216_vm0 = vcmp.eq.f32.partialorder %v215_v56, 8.507059e+37 }
  0xc2   :  { %472 = vmatpush.msra.mxu2 %v1238_v47  ;;  %v419_v59 = vand.u32 4294901760, %v1238_v47  ;;  %v168_v1 = vsub.f32 1.0, %v167_v62  ;;  %v1288_v48 = vand.u32 4294901760, %v344_v40 }
  0xc3   :  { %v305_v61 = vadd.f32 1.0, %v1020_v51  ;;  %v136_v51 = vmul.f32 0.5, %v1199_v27  ;;  %v314_v27 = vld [vmem:[%s1467_s3 + $0x18] sm:$0xff] }
  0xc4   :  { %v420_v23 = vsub.f32 %v1238_v47, %v419_v59  ;;  %v169_v6 = vmul.f32 %v1049_v58, %v168_v1  ;;  %321 = vperm.xlu1 %1042, %v315_v31   ;;  %v381_v36 = vsub.f32 %v344_v40, %v1288_v48  ;;  %v350_v8 = vsel %vm339_vm8, %v314_v27, 0 }
  0xc5   :  { %v309_v63 = vmul.f32 %v305_v61, %v137_v60  ;;  %v1051_v12 = vpop.eup %1050  ;;  %v347_v60 = vsel %vm339_vm8, %v313_v54, 0 }
  0xc6   :  { %v421_v44 = vand.u32 4294901760, %v420_v23  ;;  %v170_v9 = vadd.f32 %v1049_v58, %v169_v6  ;;  %v207_v18 = vmul.f32 %v1051_v12, %v1241_v57  ;;  %vm212_vm13 = vweird.f32 %v1051_v12 }
  0xc7   :  { %v1251_v7 = vand.u32 4294901760, %v309_v63  ;;  %vm213_vm15 = vmor %vm211_vm14, %vm212_vm13  ;;  %v375_v57 = vsub.f32 %v373_v38, %v374_v46  ;;  %v1296_v0 = vand.u32 4294901760, %v347_v60 }
  0xc8   :  { %422 = vmatpush.msra.mxu1 %v421_v44  ;;  %v174_v17 = vsel %vm173_vm11, %v1049_v58, %v170_v9  ;;  %v208_v49 = vsub.f32 1.0, %v207_v18 }
  0xc9   :  { %367 = vmatpush.msra.mxu0 %v1251_v7  ;;  %v1258_v10 = vsub.f32 %v309_v63, %v1251_v7  ;;  %518 = vmatpush.msra.mxu3 %v1251_v7  ;;  %v179_v20 = vsel %vm176_vm12, %v178_v15, %v174_v17  ;;  %v376_v62 = vand.u32 4294901760, %v375_v57  ;;  %v382_v63 = vand.u32 4294901760, %v381_v36 }
  0xca   :  { %v180_v21 = vmul.f32 %v179_v20, %v155_v14  ;;  %v209_v33 = vmul.f32 %v1051_v12, %v208_v49  ;;  %v389_v4 = vsub.f32 %v347_v60, %v1296_v0  ;;  %v396_v15 = vand.u32 4294901760, %v350_v8 }
  0xcb   :  { %475 = vmatpush.msra.mxu2 %v1258_v10  ;;  %v425_v19 = vand.u32 4294901760, %v1258_v10  ;;  %v383_v3 = vsub.f32 %v381_v36, %v382_v63 }
  0xcc   :  { %v1018_v29 = vclamps-f32 %v180_v21, 1.0  ;;  %v210_v35 = vadd.f32 %v1051_v12, %v209_v33  ;;  %v390_v14 = vand.u32 4294901760, %v389_v4 }
  0xcd   :  { %v426_v22 = vsub.f32 %v1258_v10, %v425_v19 }
  0xce   :  { %v303_v24 = vadd.f32 1.0, %v1018_v29  ;;  %v214_v43 = vsel %vm213_vm15, %v1051_v12, %v210_v35  ;;  %v384_v12 = vand.u32 4294901760, %v383_v3  ;;  %v391_v47 = vsub.f32 %v389_v4, %v390_v14 }
  0xcf   :  { %v427_v30 = vand.u32 4294901760, %v426_v22  ;;  %v219_v5 = vsel %vm216_vm0, %v218_v37, %v214_v43 }
  0xd0   :  { %v307_v41 = vmul.f32 %v303_v24, %v135_v34  ;;  %v220_v45 = vmul.f32 %v219_v5, %v195_v42  ;;  %v392_v10 = vand.u32 4294901760, %v391_v47 }
  0xd1   :  { %428 = vmatpush.msra.mxu1 %v427_v30 }
  0xd2   :  { %v1019_v50 = vclamps-f32 %v220_v45, 1.0  ;;  %v370_v53 = vand.u32 4294901760, %v307_v41 }
  0xd4   :  { %v304_v55 = vadd.f32 1.0, %v1019_v50  ;;  %v436_v39 = vsub.f32 %v307_v41, %v370_v53 }
  0xd6   :  { %v308_v58 = vmul.f32 %v304_v55, %v136_v51  ;;  %v437_v23 = vand.u32 4294901760, %v436_v39 }
  0xd8   :  { %v368_v61 = vand.u32 4294901760, %v308_v58  ;;  %v438_v44 = vsub.f32 %v436_v39, %v437_v23 }
  0xda   :  { %369 = vmatpush.msra.mxu0 %v368_v61  ;;  %520 = vmatpush.msra.mxu3 %v368_v61  ;;  %v430_v1 = vsub.f32 %v308_v58, %v368_v61  ;;  %v439_v11 = vand.u32 4294901760, %v438_v44 }
  0xdc   :  { %371 = vmatpush.msra.mxu0 %v370_v53  ;;  %478 = vmatpush.msra.mxu2 %v430_v1  ;;  %v431_v2 = vand.u32 4294901760, %v430_v1 }
  0xdd   :  { %522 = vmatpush.msra.mxu3 %v370_v53  ;;  %377 = vmatmul.f32.vlgmr.msra.gmra.mxu0 %v376_v62 }
  0xde   :  { %563 = vmatpush.msrb.mxu0 %v419_v59  ;;  %481 = vmatpush.msra.mxu2 %v436_v39  ;;  %v432_v6 = vsub.f32 %v430_v1, %v431_v2  ;;  %v397_v59 = vsub.f32 %v350_v8, %v396_v15 }
  0xdf   :  { %484 = vmatmul.f32.vlgmr.msra.gmra.mxu2 %v373_v38  ;;  %526 = vmatmul.f32.vlgmr.msra.gmra.mxu3 %v374_v46 }
  0xe0   :  { %567 = vmatpush.msrb.mxu0 %v425_v19  ;;  %v433_v9 = vand.u32 4294901760, %v432_v6  ;;  %v398_v17 = vand.u32 4294901760, %v397_v59  ;;  %v316_v19 = vld [vmem:[%s1468_s4 + $0x8] sm:$0xff] }
  0xe1   :  { %326 = vperm.xlu2 %1043, %v316_v19  }
  0xe2   :  { %571 = vmatpush.msrb.mxu0 %v431_v2  ;;  %434 = vmatpush.msra.mxu1 %v433_v9  ;;  %v399_v18 = vsub.f32 %v397_v59, %v398_v17 }
  0xe4   :  { %575 = vmatpush.msrb.mxu0 %v437_v23  ;;  %440 = vmatpush.msra.mxu1 %v439_v11 }
  0xe5   :  { %385 = vmatmul.f32.gmra.mxu0 %v384_v12  ;;  %442 = vmatmul.f32.vlgmr.msra.gmra.mxu1 %v1275_v28 }
  0xe6   :  { %606 = vmatpush.msrb.mxu1 %v1232_v52  ;;  %v400_v52 = vand.u32 4294901760, %v399_v18 }
  0xe7   :  { %489 = vmatmul.f32.gmra.mxu2 %v381_v36  ;;  %532 = vmatmul.f32.gmra.mxu3 %v382_v63 }
  0xe8   :  { %608 = vmatpush.msrb.mxu1 %v1251_v7  ;;  %v807_v7 = vld [vmem:[%s1470_s6] sm:$0x3] }
  0xe9   :  { %810 = vperm.xlu2 %1043, %v807_v7  }
  0xea   :  { %610 = vmatpush.msrb.mxu1 %v368_v61 }
  0xec   :  { %612 = vmatpush.msrb.mxu1 %v370_v53 }
  0xed   :  { %393 = vmatmul.f32.gmra.mxu0 %v392_v10  ;;  %446 = vmatmul.f32.gmra.mxu1 %v1288_v48 }
  0xef   :  { %494 = vmatmul.f32.gmra.mxu2 %v389_v4  ;;  %538 = vmatmul.f32.gmra.mxu3 %v390_v14 }
  0xf5   :  { %401 = vmatmul.f32.gmra.mxu0 %v400_v52  ;;  %450 = vmatmul.f32.gmra.mxu1 %v1296_v0 }
  0xf7   :  { %499 = vmatmul.f32.gmra.mxu2 %v397_v59  ;;  %544 = vmatmul.f32.gmra.mxu3 %v398_v17 }
  0xfd   :  { %454 = vmatmul.f32.gmra.mxu1 %v396_v15  ;;  %577 = vmatmul.f32.vlgmr.msrb.gmra.mxu0 %v1275_v28 }
 0x105   :  { %581 = vmatmul.f32.gmra.mxu0 %v1288_v48  ;;  %614 = vmatmul.f32.vlgmr.msrb.gmra.mxu1 %v1275_v28 }
 0x10d   :  { %585 = vmatmul.f32.gmra.mxu0 %v1296_v0  ;;  %618 = vmatmul.f32.gmra.mxu1 %v1288_v48 }
 0x115   :  { %589 = vmatmul.f32.gmra.mxu0 %v396_v15  ;;  %622 = vmatmul.f32.gmra.mxu1 %v1296_v0 }
 0x11d   :  { %626 = vmatmul.f32.gmra.mxu1 %v396_v15 }
 0x12e   :  { %v332_v49 = vpop.permute.xlu1 %331 }
 0x12f   :  { %v337_v36 = vpop.permute.xlu0 %336 }
 0x136   :  { %v322_v56 = vpop.permute.xlu1 %321 }
 0x13b   :  { %v327_v34 = vpop.permute.xlu2 %326 }
 0x15a   :  { %v378_v13 = vpop.f32.mrf.mxu0 }
 0x15b   :  { %v379_v30 = vadd.f32 %v378_v13, %v322_v56 }
 0x162   :  { %v386_v20 = vpop.f32.mrf.mxu0  ;;  %v443_v21 = vpop.f32.mrf.mxu1 }
 0x163   :  { %v485_v26 = vpop.f32.mrf.mxu2  ;;  %v527_v28 = vpop.f32.mrf.mxu3  ;;  %v444_v32 = vadd.f32 %v443_v21, %v379_v30  ;;  %v387_v38 = vadd.f32 %v386_v20, %v327_v34 }
 0x165   :  { %v486_v37 = vadd.f32 %v485_v26, %v444_v32 }
 0x167   :  { %v528_v31 = vadd.f32 %v527_v28, %v486_v37 }
 0x16a   :  { %v394_v22 = vpop.f32.mrf.mxu0  ;;  %v447_v25 = vpop.f32.mrf.mxu1 }
 0x16b   :  { %v490_v40 = vpop.f32.mrf.mxu2  ;;  %v448_v41 = vadd.f32 %v447_v25, %v387_v38  ;;  %v533_v42 = vpop.f32.mrf.mxu3  ;;  %v395_v46 = vadd.f32 %v394_v22, %v332_v49 }
 0x16d   :  { %v491_v48 = vadd.f32 %v490_v40, %v448_v41 }
 0x16f   :  { %v534_v51 = vadd.f32 %v533_v42, %v491_v48 }
 0x172   :  { %v402_v29 = vpop.f32.mrf.mxu0  ;;  %v451_v33 = vpop.f32.mrf.mxu1 }
 0x173   :  { %v495_v54 = vpop.f32.mrf.mxu2  ;;  %v452_v55 = vadd.f32 %v451_v33, %v395_v46  ;;  %v539_v60 = vpop.f32.mrf.mxu3  ;;  %v403_v63 = vadd.f32 %v402_v29, %v337_v36 }
 0x175   :  { %v496_v62 = vadd.f32 %v495_v54, %v452_v55 }
 0x177   :  { %v540_v3 = vadd.f32 %v539_v60, %v496_v62 }
 0x17a   :  { %v455_v24 = vpop.f32.mrf.mxu1  ;;  %v578_v35 = vpop.f32.mrf.mxu0 }
 0x17b   :  { %v579_v43 = vadd.f32 %v578_v35, %v528_v31  ;;  %v456_v4 = vadd.f32 %v455_v24, %v403_v63  ;;  %v500_v44 = vpop.f32.mrf.mxu2  ;;  %v545_v16 = vpop.f32.mrf.mxu3 }
 0x17d   :  { %v501_v11 = vadd.f32 %v500_v44, %v456_v4 }
 0x17f   :  { %v546_v20 = vadd.f32 %v545_v16, %v501_v11 }
 0x182   :  { %v582_v5 = vpop.f32.mrf.mxu0  ;;  %v615_v45 = vpop.f32.mrf.mxu1 }
 0x183   :  { %v1327_v50 = vadd.f32 %v615_v45, %v579_v43  ;;  %v583_v58 = vadd.f32 %v582_v5, %v534_v51 }
 0x185   :  { %v1330_v53 = vmul.f32 0.70710677, %v1327_v50 }
 0x187   :  { %v638_v57 = vmul.f32 %v1330_v53, %v1330_v53 }
 0x189   :  { %v1334_v39 = vmin.f32 %v638_v57, 16.0 }
 0x18a   :  { %v619_v61 = vpop.f32.mrf.mxu1  ;;  %v586_v23 = vpop.f32.mrf.mxu0 }
 0x18b   :  { %v651_v0 = vmul.f32 3.8918573e-05, %v1334_v39  ;;  %v1337_v1 = vadd.f32 %v619_v61, %v583_v58  ;;  %v587_v12 = vadd.f32 %v586_v23, %v540_v3  ;;  %v640_v10 = vmul.f32 2.1237322e-06, %v1334_v39 }
 0x18d   :  { %v652_v27 = vadd.f32 0.001143296, %v651_v0  ;;  %v1340_v2 = vmul.f32 0.70710677, %v1337_v1  ;;  %v641_v49 = vadd.f32 0.00028619796, %v640_v10 }
 0x18f   :  { %v653_v6 = vmul.f32 %v652_v27, %v1334_v39  ;;  %v678_v8 = vmul.f32 %v1340_v2, %v1340_v2  ;;  %v642_v24 = vmul.f32 %v641_v49, %v1334_v39 }
 0x191   :  { %v654_v9 = vadd.f32 0.014752088, %v653_v6  ;;  %v1345_v14 = vmin.f32 %v678_v8, 16.0  ;;  %v643_v5 = vadd.f32 0.0036580483, %v642_v24 }
 0x192   :  { %v623_v15 = vpop.f32.mrf.mxu1  ;;  %v590_v7 = vpop.f32.mrf.mxu0 }
 0x193   :  { %v655_v47 = vmul.f32 %v654_v9, %v1334_v39  ;;  %v1348_v59 = vadd.f32 %v623_v15, %v587_v12  ;;  %v691_v17 = vmul.f32 3.8918573e-05, %v1345_v14  ;;  %v680_v19 = vmul.f32 2.1237322e-06, %v1345_v14 }
 0x194   :  { %v591_v29 = vadd.f32 %v590_v7, %v546_v20  ;;  %v644_v58 = vmul.f32 %v643_v5, %v1334_v39 }
 0x195   :  { %v656_v18 = vadd.f32 0.112945676, %v655_v47  ;;  %v692_v52 = vadd.f32 0.001143296, %v691_v17  ;;  %v1354_v13 = vmul.f32 0.70710677, %v1348_v59 }
 0x196   :  { %v681_v26 = vadd.f32 0.00028619796, %v680_v19  ;;  %v645_v8 = vadd.f32 0.05243302, %v644_v58 }
 0x197   :  { %v657_v21 = vmul.f32 %v656_v18, %v1334_v39  ;;  %v693_v22 = vmul.f32 %v692_v52, %v1345_v14  ;;  %v718_v25 = vmul.f32 %v1354_v13, %v1354_v13 }
 0x198   :  { %v682_v38 = vmul.f32 %v681_v26, %v1345_v14  ;;  %v646_v18 = vmul.f32 %v645_v8, %v1334_v39 }
 0x199   :  { %v658_v56 = vadd.f32 0.4994258, %v657_v21  ;;  %v694_v33 = vadd.f32 0.014752088, %v693_v22  ;;  %v1360_v30 = vmin.f32 %v718_v25, 16.0 }
 0x19a   :  { %v627_v28 = vpop.f32.mrf.mxu1  ;;  %v683_v46 = vadd.f32 0.0036580483, %v682_v38 }
 0x19b   :  { %v659_v32 = vmul.f32 %v658_v56, %v1334_v39  ;;  %v1363_v34 = vadd.f32 %v627_v28, %v591_v29  ;;  %v695_v35 = vmul.f32 %v694_v33, %v1345_v14  ;;  %v720_v37 = vmul.f32 2.1237322e-06, %v1360_v30 }
 0x19c   :  { %v731_v40 = vmul.f32 3.8918573e-05, %v1360_v30  ;;  %v684_v61 = vmul.f32 %v683_v46, %v1345_v14  ;;  %v647_v29 = vadd.f32 0.18741608, %v646_v18 }
 0x19d   :  { %v1371_v31 = vmul.f32 0.70710677, %v1363_v34  ;;  %v1373_v41 = vadd.f32 1.0, %v659_v32  ;;  %v696_v42 = vadd.f32 0.112945676, %v695_v35 }
 0x19e   :  { %v721_v43 = vadd.f32 0.00028619796, %v720_v37  ;;  %v732_v48 = vadd.f32 0.001143296, %v731_v40  ;;  %v685_v9 = vadd.f32 0.05243302, %v684_v61  ;;  %v648_v5 = vmul.f32 %v647_v29, %v1334_v39 }
 0x19f   :  { %v697_v45 = vmul.f32 %v696_v42, %v1345_v14  ;;  %v758_v54 = vmul.f32 %v1371_v31, %v1371_v31  ;;  %1052 = vrcp.f32 %v1373_v41  ;;  %vm666_vm3 = vweird.f32 %v1373_v41 }
 0x1a0   :  { %v722_v55 = vmul.f32 %v721_v43, %v1360_v30  ;;  %v733_v57 = vmul.f32 %v732_v48, %v1360_v30  ;;  %v686_v19 = vmul.f32 %v685_v9, %v1345_v14 }
 0x1a1   :  { %v698_v51 = vadd.f32 0.4994258, %v697_v45  ;;  %v1381_v36 = vmin.f32 %v758_v54, 16.0 }
 0x1a2   :  { %v734_v62 = vadd.f32 0.014752088, %v733_v57  ;;  %v723_v27 = vadd.f32 0.0036580483, %v722_v55  ;;  %v687_v33 = vadd.f32 0.18741608, %v686_v19 }
 0x1a3   :  { %v699_v60 = vmul.f32 %v698_v51, %v1345_v14  ;;  %v760_v63 = vmul.f32 2.1237322e-06, %v1381_v36  ;;  %v771_v0 = vmul.f32 3.8918573e-05, %v1381_v36  ;;  %v670_v55 = vand.u32 2147483647, %v1373_v41 }
 0x1a4   :  { %v735_v3 = vmul.f32 %v734_v62, %v1360_v30  ;;  %v724_v15 = vmul.f32 %v723_v27, %v1360_v30  ;;  %v688_v42 = vmul.f32 %v687_v33, %v1345_v14  ;;  %v672_v57 = vand.u32 2147483648, %v1373_v41 }
 0x1a5   :  { %v1388_v23 = vadd.f32 1.0, %v699_v60  ;;  %v761_v4 = vadd.f32 0.00028619796, %v760_v63  ;;  %v772_v6 = vadd.f32 0.001143296, %v771_v0  ;;  %v1391_v44 = vpop.eup %1052  ;;  %vm671_vm7 = vcmp.eq.f32.partialorder %v670_v55, 8.507059e+37 }
 0x1a6   :  { %v736_v12 = vadd.f32 0.112945676, %v735_v3  ;;  %v662_v16 = vmul.f32 %v1391_v44, %v1373_v41  ;;  %v725_v20 = vadd.f32 0.05243302, %v724_v15  ;;  %vm667_vm1 = vweird.f32 %v1391_v44 }
 0x1a7   :  { %1054 = vrcp.f32 %v1388_v23  ;;  %v762_v11 = vmul.f32 %v761_v4, %v1381_v36  ;;  %v773_v47 = vmul.f32 %v772_v6, %v1381_v36  ;;  %v712_v14 = vand.u32 2147483648, %v1388_v23  ;;  %vm1418_vm4 = vmor %vm666_vm3, %vm667_vm1 }
 0x1a8   :  { %v737_v10 = vmul.f32 %v736_v12, %v1360_v30  ;;  %v663_v22 = vsub.f32 1.0, %v662_v16  ;;  %v726_v32 = vmul.f32 %v725_v20, %v1360_v30  ;;  %v689_v58 = vadd.f32 1.1283791, %v688_v42 }
 0x1a9   :  { %v774_v17 = vadd.f32 0.014752088, %v773_v47  ;;  %v763_v21 = vadd.f32 0.0036580483, %v762_v11  ;;  %vm706_vm5 = vweird.f32 %v1388_v23  ;;  %v710_v60 = vand.u32 2147483647, %v1388_v23 }
 0x1aa   :  { %v738_v52 = vadd.f32 0.4994258, %v737_v10  ;;  %v664_v38 = vmul.f32 %v1391_v44, %v663_v22  ;;  %v727_v45 = vadd.f32 0.18741608, %v726_v32  ;;  %v673_v6 = vor.u32 1.1754944e-38, %v672_v57 }
 0x1ab   :  { %v775_v49 = vmul.f32 %v774_v17, %v1381_v36  ;;  %v764_v35 = vmul.f32 %v763_v21, %v1381_v36  ;;  %v713_v8 = vor.u32 1.1754944e-38, %v712_v14  ;;  %v690_v9 = vmul.f32 %v689_v58, %v1340_v2 }
 0x1ac   :  { %v739_v56 = vmul.f32 %v738_v52, %v1360_v30  ;;  %v665_v48 = vadd.f32 %v1391_v44, %v664_v38  ;;  %v728_v3 = vmul.f32 %v727_v45, %v1360_v30  ;;  %vm711_vm9 = vcmp.eq.f32.partialorder %v710_v60, 8.507059e+37 }
 0x1ad   :  { %v1055_v7 = vpop.eup %1054  ;;  %v776_v26 = vadd.f32 0.112945676, %v775_v49  ;;  %v765_v46 = vadd.f32 0.05243302, %v764_v35 }
 0x1ae   :  { %v702_v25 = vmul.f32 %v1055_v7, %v1388_v23  ;;  %v740_v24 = vadd.f32 1.0, %v739_v56  ;;  %vm707_vm2 = vweird.f32 %v1055_v7  ;;  %v669_v0 = vsel %vm1418_vm4, %v1391_v44, %v665_v48 }
 0x1af   :  { %v777_v37 = vmul.f32 %v776_v26, %v1381_v36  ;;  %vm1426_vm6 = vmor %vm706_vm5, %vm707_vm2  ;;  %v766_v41 = vmul.f32 %v765_v46, %v1381_v36  ;;  %v649_v23 = vadd.f32 1.1283791, %v648_v5  ;;  %v674_v15 = vsel %vm671_vm7, %v673_v6, %v669_v0 }
 0x1b0   :  { %v703_v28 = vsub.f32 1.0, %v702_v25  ;;  %1056 = vrcp.f32 %v740_v24  ;;  %v752_v47 = vand.u32 2147483648, %v740_v24  ;;  %v729_v16 = vadd.f32 1.1283791, %v728_v3  ;;  %v806_v25 = vld [vmem:[%s1469_s5] sm:$0x3] }
 0x1b1   :  { %v778_v43 = vadd.f32 0.4994258, %v777_v37  ;;  %v767_v44 = vadd.f32 0.18741608, %v766_v41  ;;  %v750_v17 = vand.u32 2147483647, %v740_v24  ;;  %v650_v30 = vmul.f32 %v649_v23, %v1330_v53 }
 0x1b2   :  { %v704_v40 = vmul.f32 %v1055_v7, %v703_v28  ;;  %vm746_vm11 = vweird.f32 %v740_v24  ;;  %v753_v20 = vor.u32 1.1754944e-38, %v752_v47  ;;  %v730_v21 = vmul.f32 %v729_v16, %v1354_v13  ;;  %s1089_s5 = smov [#allocation2]  }
 0x1b3   :  { %v779_v51 = vmul.f32 %v778_v43, %v1381_v36  ;;  %v768_v2 = vmul.f32 %v767_v44, %v1381_v36  ;;  %vm751_vm13 = vcmp.eq.f32.partialorder %v750_v17, 8.507059e+37  ;;  %v814_v36 = vsel %vm339_vm8, %v806_v25, 0  ;;  %s1007_s10 = sshll.u32 %s1089_s5, 4  ;;  %s1008_s10 = int_to_ptr.vmem [resolvable:$true] %s1007_s10 }
 0x1b4   :  { %v705_v54 = vadd.f32 %v1055_v7, %v704_v40  ;;  %v632_v37 = vmul.f32 0.5, %v1348_v59  ;;  %v631_v5 = vmul.f32 0.5, %v1337_v1  ;;  %v1452_v46 = vand.u32 4294901760, %v814_v36 }
 0x1b5   :  { %v1424_v61 = vadd.f32 1.0, %v779_v51  ;;  %v769_v28 = vadd.f32 1.1283791, %v768_v2  ;;  %v630_v59 = vmul.f32 0.5, %v1327_v50 }
 0x1b6   :  { %v1057_v62 = vpop.eup %1056  ;;  %v709_v27 = vsel %vm1426_vm6, %v1055_v7, %v705_v54  ;;  %v675_v7 = vmul.f32 %v674_v15, %v650_v30  ;;  %v837_v39 = vsub.f32 %v814_v36, %v1452_v46 }
 0x1b7   :  { %v742_v4 = vmul.f32 %v1057_v62, %v740_v24  ;;  %1058 = vrcp.f32 %v1424_v61  ;;  %v714_v11 = vsel %vm711_vm9, %v713_v8, %v709_v27  ;;  %vm747_vm10 = vweird.f32 %v1057_v62 }
 0x1b8   :  { %v715_v18 = vmul.f32 %v714_v11, %v690_v9  ;;  %vm748_vm12 = vmor %vm746_vm11, %vm747_vm10  ;;  %v1022_v33 = vclamps-f32 %v675_v7, 1.0  ;;  %v792_v32 = vand.u32 2147483648, %v1424_v61  ;;  %v790_v35 = vand.u32 2147483647, %v1424_v61  ;;  %v811_v7 = vpop.permute.xlu2 %810 }
 0x1b9   :  { %v743_v12 = vsub.f32 1.0, %v742_v4  ;;  %vm786_vm15 = vweird.f32 %v1424_v61  ;;  %v770_v54 = vmul.f32 %v769_v28, %v1371_v31  ;;  %v838_v41 = vand.u32 4294901760, %v837_v39 }
 0x1ba   :  { %v1023_v56 = vclamps-f32 %v715_v18, 1.0  ;;  %v798_v43 = vadd.f32 1.0, %v1022_v33  ;;  %v793_v45 = vor.u32 1.1754944e-38, %v792_v32  ;;  %vm791_vm8 = vcmp.eq.f32.partialorder %v790_v35, 8.507059e+37 }
 0x1bb   :  { %v744_v10 = vmul.f32 %v1057_v62, %v743_v12  ;;  %v839_v23 = vsub.f32 %v837_v39, %v838_v41 }
 0x1bc   :  { %v799_v38 = vadd.f32 1.0, %v1023_v56  ;;  %v802_v58 = vmul.f32 %v798_v43, %v630_v59 }
 0x1bd   :  { %v745_v19 = vadd.f32 %v1057_v62, %v744_v10  ;;  %v1059_v52 = vpop.eup %1058  ;;  %v840_v15 = vand.u32 4294901760, %v839_v23 }
 0x1be   :  { %v782_v22 = vmul.f32 %v1059_v52, %v1424_v61  ;;  %vm787_vm14 = vweird.f32 %v1059_v52  ;;  %v803_v57 = vmul.f32 %v799_v38, %v631_v5  ;;  %v834_v0 = vand.u32 4294901760, %v802_v58 }
 0x1bf   :  { %v749_v49 = vsel %vm748_vm12, %v1057_v62, %v745_v19  ;;  %vm788_vm0 = vmor %vm786_vm15, %vm787_vm14  ;;  %v633_v62 = vmul.f32 0.5, %v1363_v34 }
 0x1c0   :  { %v754_v53 = vsel %vm751_vm13, %v753_v20, %v749_v49  ;;  %v783_v29 = vsub.f32 1.0, %v782_v22  ;;  %v832_v1 = vand.u32 4294901760, %v803_v57  ;;  %v876_v8 = vsub.f32 %v802_v58, %v834_v0 }
 0x1c1   :  { %v755_v26 = vmul.f32 %v754_v53, %v730_v21 }
 0x1c2   :  { %v784_v13 = vmul.f32 %v1059_v52, %v783_v29  ;;  %v870_v4 = vsub.f32 %v803_v57, %v832_v1  ;;  %v877_v34 = vand.u32 4294901760, %v876_v8 }
 0x1c3   :  { %v1024_v24 = vclamps-f32 %v755_v26, 1.0 }
 0x1c4   :  { %v785_v42 = vadd.f32 %v1059_v52, %v784_v13  ;;  %v871_v12 = vand.u32 4294901760, %v870_v4  ;;  %v878_v17 = vsub.f32 %v876_v8, %v877_v34 }
 0x1c5   :  { %v800_v40 = vadd.f32 1.0, %v1024_v24 }
 0x1c6   :  { %v789_v51 = vsel %vm788_vm0, %v1059_v52, %v785_v42  ;;  %v872_v16 = vsub.f32 %v870_v4, %v871_v12  ;;  %v879_v18 = vand.u32 4294901760, %v878_v17 }
 0x1c7   :  { %v804_v48 = vmul.f32 %v800_v40, %v632_v37  ;;  %v794_v55 = vsel %vm791_vm8, %v793_v45, %v789_v51 }
 0x1c8   :  { %v795_v14 = vmul.f32 %v794_v55, %v770_v54  ;;  %v873_v30 = vand.u32 4294901760, %v872_v16 }
 0x1c9   :  { %v830_v60 = vand.u32 4294901760, %v804_v48 }
 0x1ca   :  { %v1025_v61 = vclamps-f32 %v795_v14, 1.0 }
 0x1cb   :  { %v864_v31 = vsub.f32 %v804_v48, %v830_v60 }
 0x1cc   :  { %v801_v63 = vadd.f32 1.0, %v1025_v61 }
 0x1cd   :  { %v865_v50 = vand.u32 4294901760, %v864_v31 }
 0x1ce   :  { %v805_v27 = vmul.f32 %v801_v63, %v633_v62 }
 0x1cf   :  { %v866_v47 = vsub.f32 %v864_v31, %v865_v50 }
 0x1d0   :  { %v828_v3 = vand.u32 4294901760, %v805_v27 }
 0x1d1   :  { %v867_v10 = vand.u32 4294901760, %v866_v47 }
 0x1d2   :  { %v858_v6 = vsub.f32 %v805_v27, %v828_v3  ;;  %829 = vmatpush.msrb.mxu2 %v828_v3 }
 0x1d4   :  { %831 = vmatpush.msrb.mxu2 %v830_v60  ;;  %v859_v9 = vand.u32 4294901760, %v858_v6 }
 0x1d6   :  { %833 = vmatpush.msrb.mxu2 %v832_v1  ;;  %v860_v11 = vsub.f32 %v858_v6, %v859_v9 }
 0x1d8   :  { %835 = vmatpush.msrb.mxu2 %v834_v0  ;;  %v861_v44 = vand.u32 4294901760, %v860_v11 }
 0x1d9   :  { %841 = vmatmul.f32.vlgmr.msrb.gmra.mxu2 %v840_v15 }
 0x1da   :  { %900 = vmatpush.msra.mxu2 %v858_v6  ;;  %862 = vmatpush.msrb.mxu3 %v861_v44 }
 0x1dc   :  { %903 = vmatpush.msra.mxu2 %v864_v31  ;;  %868 = vmatpush.msrb.mxu3 %v867_v10 }
 0x1de   :  { %906 = vmatpush.msra.mxu2 %v870_v4  ;;  %874 = vmatpush.msrb.mxu3 %v873_v30 }
 0x1e0   :  { %909 = vmatpush.msra.mxu2 %v876_v8  ;;  %880 = vmatpush.msrb.mxu3 %v879_v18 }
 0x1e1   :  { %882 = vmatmul.f32.vlgmr.msrb.gmra.mxu3 %v1452_v46  ;;  %912 = vmatmul.f32.vlgmr.msra.gmra.mxu2 %v837_v39 }
 0x1e2   :  { %958 = vmatpush.msrb.mxu2 %v859_v9  ;;  %929 = vmatpush.msra.mxu3 %v828_v3 }
 0x1e4   :  { %962 = vmatpush.msrb.mxu2 %v865_v50  ;;  %931 = vmatpush.msra.mxu3 %v830_v60 }
 0x1e6   :  { %966 = vmatpush.msrb.mxu2 %v871_v12  ;;  %933 = vmatpush.msra.mxu3 %v832_v1 }
 0x1e8   :  { %970 = vmatpush.msrb.mxu2 %v877_v34  ;;  %935 = vmatpush.msra.mxu3 %v834_v0 }
 0x1e9   :  { %939 = vmatmul.f32.vlgmr.msra.gmra.mxu3 %v838_v41  ;;  %972 = vmatmul.f32.vlgmr.msrb.gmra.mxu2 %v1452_v46 }
 0x1ea   :  { %989 = vmatpush.msrb.mxu3 %v828_v3 }
 0x1ec   :  { %991 = vmatpush.msrb.mxu3 %v830_v60 }
 0x1ee   :  { %993 = vmatpush.msrb.mxu3 %v832_v1 }
 0x1f0   :  { %995 = vmatpush.msrb.mxu3 %v834_v0 }
 0x1f1   :  { %997 = vmatmul.f32.vlgmr.msrb.gmra.mxu3 %v1452_v46 }
 0x25c   :  { %v842_v19 = vpop.f32.mrf.mxu2 }
 0x25d   :  { %v843_v2 = vadd.f32 %v842_v19, %v811_v7 }
 0x264   :  { %v883_v52 = vpop.f32.mrf.mxu3  ;;  %v913_v20 = vpop.f32.mrf.mxu2 }
 0x265   :  { %v884_v21 = vadd.f32 %v883_v52, %v843_v2 }
 0x267   :  { %v914_v22 = vadd.f32 %v913_v20, %v884_v21 }
 0x26c   :  { %v940_v49 = vpop.f32.mrf.mxu3  ;;  %v973_v53 = vpop.f32.mrf.mxu2 }
 0x26d   :  { %v941_v25 = vadd.f32 %v940_v49, %v914_v22 }
 0x26f   :  { %v974_v56 = vadd.f32 %v973_v53, %v941_v25 }
 0x274   :  { %v998_v26 = vpop.f32.mrf.mxu3 }
 0x275   :  { %v999_v29 = vadd.f32 %v998_v26, %v974_v56 }
 0x277   :  { %1001 = vst [vmem:[#allocation2] sm:$0x3] %v999_v29 }
 0x278   :  { %1012 = dma.vmem_to_hbm [thread:$0]  %s1008_s10, 32, %s1010_s13, [#allocation3]  }
 0x279   :  { %1084 = dma.done.wait [#allocation3], 32  }
 0x27a   :  { %1085 = vsyncadd [#allocation3], 4294967264 }
 0x27b   :  { %1017 = vsyncpa [#allocation3], 1 }

</bundles_post_ra>
